<compile_context>
chip_gen: v5e
topology: v5e:2x2
jax: 0.10.0
libtpu: 0.0.40
codegen_flags: <defaults>
</compile_context>

<pallas_src>
import functools

import jax
import jax.numpy as jnp
from jax.experimental import pallas as pl
from jax.experimental.pallas import tpu as pltpu


def _round_up(x, m):
    return ((x + m - 1) // m) * m


def _pick_vmem_limit(needed_bytes):
    """Generation-aware scoped-VMEM budget (v5e/v6e: 128 MiB, v7x: 64 MiB)."""
    cap = 64 << 20  # conservative default = v7x physical VMEM per TensorCore
    try:
        cap = int(pltpu.get_tpu_info().vmem_capacity_bytes)
    except Exception:
        pass
    ceiling = (cap * 7) // 8
    return int(min(max(2 * needed_bytes, 16 << 20), ceiling))


def _fused_gcn_kernel(a_ref, h0_ref, dinv_ref, w0_ref, wr_ref, b_ref, o_ref,
                      hw_scr, *, n_layers):
    layer = pl.program_id(0)

    # Feature transform on the bf16 MXU (f32 accumulation); result is stored
    # once as bf16 -- it is the bf16 operand of the aggregation matmul anyway.
    @pl.when(layer == 0)
    def _first_transform():
        hw_scr[...] = jnp.dot(
            h0_ref[...], w0_ref[...],
            preferred_element_type=jnp.float32).astype(jnp.bfloat16)

    @pl.when(layer > 0)
    def _rest_transform():
        # Inter-layer carry lives in the resident output block (f32 -> bf16).
        hw_scr[...] = jnp.dot(
            o_ref[...].astype(jnp.bfloat16), wr_ref[0],
            preferred_element_type=jnp.float32).astype(jnp.bfloat16)

    # Neighborhood aggregation: A is exact 0/1 in bf16 -> native bf16 MXU
    # path with f32 accumulation.
    agg = jnp.dot(a_ref[...], hw_scr[...], preferred_element_type=jnp.float32)

    # norm='right' + bias, once per layer.
    out = agg * dinv_ref[...] + b_ref[0]

    @pl.when(layer < n_layers - 1)
    def _hidden():
        o_ref[...] = jnp.maximum(out, 0.0)      # ReLU on all but last layer

    @pl.when(layer == n_layers - 1)
    def _final():
        o_ref[...] = out                        # logits, written once


def gcn_forward(adj, features, params):
    """Fused GCN forward: every GraphConv layer in ONE pallas_call.

    adj:      [N, N] dense adjacency (adj[i, j] = 1 iff edge j -> i)
    features: [N, F_in]
    params:   list of (W [Fin, Fout], b [1, Fout])
    returns   [N, F_last] float32
    """
    n, f_in = features.shape
    n_layers = len(params)
    f_out_last = params[-1][0].shape[1]

    # Rows padded to 128 (lane-dense, MXU-aligned).  Layer 0 keeps its true
    # padded input width; all layer OUTPUTS / the carry share one pad fh.
    n_pad = _round_up(n, 128)
    fin0 = _round_up(f_in, 128)
    fh = _round_up(max(w.shape[1] for w, _ in params), 128)

    # Zero padding preserves the math exactly: padded adjacency columns are
    # zero, so junk in padded node rows never reaches real outputs.
    a_p = jnp.zeros((n_pad, n_pad), jnp.bfloat16).at[:n, :n].set(
        adj.astype(jnp.bfloat16))                          # 0/1 exact in bf16
    h_p = jnp.zeros((n_pad, fin0), jnp.bfloat16).at[:n, :f_in].set(
        features.astype(jnp.bfloat16))

    # Right-norm reciprocal computed once outside the kernel (tiny operand).
    deg = jnp.sum(adj.astype(jnp.float32), axis=1, keepdims=True)
    dinv_p = jnp.zeros((n_pad, 1), jnp.float32).at[:n].set(
        1.0 / jnp.maximum(deg, 1.0))

    w0, _ = params[0]
    w0_p = jnp.zeros((fin0, fh), jnp.bfloat16).at[
        :w0.shape[0], :w0.shape[1]].set(w0.astype(jnp.bfloat16))

    n_rest = max(n_layers - 1, 1)
    wr_p = jnp.zeros((n_rest, fh, fh), jnp.bfloat16)
    for i, (w, _) in enumerate(params[1:]):
        wr_p = wr_p.at[i, :w.shape[0], :w.shape[1]].set(w.astype(jnp.bfloat16))

    b_p = jnp.zeros((n_layers, 1, fh), jnp.float32)
    for i, (w, b) in enumerate(params):
        b_p = b_p.at[i, 0, :w.shape[1]].set(
            jnp.reshape(b, (-1,)).astype(jnp.float32))

    kernel = functools.partial(_fused_gcn_kernel, n_layers=n_layers)

    # VMEM estimate: resident A/H0/W0/dinv + double-buffered W_l/b_l +
    # resident output carry + bf16 hw scratch + in-kernel f32 temps.
    vmem_bytes = (
        a_p.size * 2 + h_p.size * 2 + w0_p.size * 2       # resident inputs
        + n_pad * 512                                      # dinv (tile-padded)
        + 2 * (fh * fh * 2 + fh * 4)                       # streamed W_l / b_l
        + n_pad * fh * 4                                   # resident out/carry
        + n_pad * fh * 2                                   # hw scratch (bf16)
        + 3 * n_pad * fh * 4)                              # agg/out temporaries
    vmem_limit = _pick_vmem_limit(vmem_bytes)

    out_p = pl.pallas_call(
        kernel,
        out_shape=jax.ShapeDtypeStruct((n_pad, fh), jnp.float32),
        grid_spec=pltpu.PrefetchScalarGridSpec(
            num_scalar_prefetch=0,
            grid=(n_layers,),                              # one step per layer
            in_specs=[
                pl.BlockSpec((n_pad, n_pad), lambda l: (0, 0)),  # A (resident)
                pl.BlockSpec((n_pad, fin0), lambda l: (0, 0)),   # H0 (resident)
                pl.BlockSpec((n_pad, 1), lambda l: (0, 0)),      # 1/deg (res.)
                pl.BlockSpec((fin0, fh), lambda l: (0, 0)),      # W0 (resident)
                pl.BlockSpec((1, fh, fh),
                             lambda l: (jnp.maximum(l - 1, 0), 0, 0)),  # W_l
                pl.BlockSpec((1, 1, fh), lambda l: (l, 0, 0)),   # b_l streamed
            ],
            out_specs=pl.BlockSpec((n_pad, fh), lambda l: (0, 0)),
            scratch_shapes=[
                pltpu.VMEM((n_pad, fh), jnp.bfloat16),     # H_l @ W_l (bf16)
            ]),
        compiler_params=pltpu.CompilerParams(
            dimension_semantics=("arbitrary",),            # layers sequential
            vmem_limit_bytes=vmem_limit),
    )(a_p, h_p, dinv_p, w0_p, wr_p, b_p)

    return out_p[:n, :f_out_last]


def init_gcn_params(key, in_feats, n_hidden, n_classes, n_layers):
    """1 input layer + (n_layers - 1) hidden layers + 1 output layer."""
    dims = [in_feats] + [n_hidden] * n_layers + [n_classes]
    params = []
    for fin, fout in zip(dims[:-1], dims[1:]):
        key, kw = jax.random.split(key)
        scale = 1.0 / jnp.sqrt(jnp.float32(fin))
        w = jax.random.uniform(kw, (fin, fout), jnp.float32, -scale, scale)
        b = jnp.zeros((1, fout), jnp.float32)
        params.append((w, b))
    return params


if __name__ == "__main__":
    key = jax.random.PRNGKey(0)

    # Small synthetic graph / feature sizes consistent with the module.
    N = 32            # number of nodes
    IN_FEATS = 16
    N_HIDDEN = 32
    N_CLASSES = 8
    N_LAYERS = 2      # -> 3 GraphConv layers total

    k_feat, k_adj, k_param = jax.random.split(key, 3)

    features = jax.random.normal(k_feat, (N, IN_FEATS), jnp.float32)

    # Random directed graph with self-loops (dense adjacency, dst-major).
    adj = (jax.random.uniform(k_adj, (N, N)) < 0.15).astype(jnp.float32)
    adj = jnp.maximum(adj, jnp.eye(N, dtype=jnp.float32))

    params = init_gcn_params(k_param, IN_FEATS, N_HIDDEN, N_CLASSES, N_LAYERS)

    out = gcn_forward(adj, features, params)
    out = jax.block_until_ready(out)
    assert out.shape == (N, N_CLASSES), out.shape

    # Pure-JAX f32 reference check (kernel runs bf16 operands with f32
    # accumulation, hence the tolerance).
    deg_inv = 1.0 / jnp.maximum(jnp.sum(adj, axis=1, keepdims=True), 1.0)
    h_ref = features
    for i, (w, b) in enumerate(params):
        h_ref = (adj @ (h_ref @ w)) * deg_inv + b
        if i != len(params) - 1:
            h_ref = jnp.maximum(h_ref, 0.0)
    assert jnp.allclose(out, h_ref, atol=5e-2, rtol=5e-2), (
        float(jnp.max(jnp.abs(out - h_ref))))

    print("KERNEL_OK")
</pallas_src>

<mosaic_0001>
module attributes {stable_mosaic.version = 11 : i64} {
  func.func @_fused_gcn_kernel(%arg0: i32, %arg1: memref<128x128xbf16, #tpu.memory_space<vmem>>, %arg2: memref<128x128xbf16, #tpu.memory_space<vmem>>, %arg3: memref<128x1xf32, #tpu.memory_space<vmem>>, %arg4: memref<128x128xbf16, #tpu.memory_space<vmem>>, %arg5: memref<1x128x128xbf16, #tpu.memory_space<vmem>>, %arg6: memref<1x1x128xf32, #tpu.memory_space<vmem>>, %arg7: memref<128x128xf32, #tpu.memory_space<vmem>>, %arg8: memref<128x128xbf16, #tpu.memory_space<vmem>>) attributes {dimension_semantics = [#tpu.dimension_semantics<arbitrary>], iteration_bounds = array<i64: 3>, scalar_prefetch = 0 : i64, scratch_operands = 1 : i64, tpu.core_type = #tpu.core_type<tc>, window_params = [{pipeline_mode = #tpu.pipeline_mode<synchronous>, transform_indices = @transform_0, window_bounds = array<i64: 128, 128>}, {pipeline_mode = #tpu.pipeline_mode<synchronous>, transform_indices = @transform_1, window_bounds = array<i64: 128, 128>}, {pipeline_mode = #tpu.pipeline_mode<synchronous>, transform_indices = @transform_2, window_bounds = array<i64: 128, 1>}, {pipeline_mode = #tpu.pipeline_mode<synchronous>, transform_indices = @transform_3, window_bounds = array<i64: 128, 128>}, {transform_indices = @transform_4, window_bounds = array<i64: 1, 128, 128>}, {transform_indices = @transform_5, window_bounds = array<i64: 1, 1, 128>}, {pipeline_mode = #tpu.pipeline_mode<synchronous>, transform_indices = @transform_6, window_bounds = array<i64: 128, 128>}]} {
    %c0_i32 = arith.constant 0 : i32
    %0 = arith.cmpi eq, %arg0, %c0_i32 : i32
    %1 = arith.extui %0 : i1 to i32
    %c0_i32_0 = arith.constant 0 : i32
    %2 = arith.cmpi ne, %1, %c0_i32_0 : i32
    scf.if %2 {
      %c0_14 = arith.constant 0 : index
      %c0_15 = arith.constant 0 : index
      %22 = vector.load %arg2[%c0_14, %c0_15] : memref<128x128xbf16, #tpu.memory_space<vmem>>, vector<128x128xbf16>
      %c0_16 = arith.constant 0 : index
      %c0_17 = arith.constant 0 : index
      %23 = vector.load %arg4[%c0_16, %c0_17] : memref<128x128xbf16, #tpu.memory_space<vmem>>, vector<128x128xbf16>
      %cst_18 = arith.constant dense<0.000000e+00> : vector<128x128xf32>
      %24 = tpu.matmul %22, %23, %cst_18 {dimension_numbers = #tpu.dot_dimension_numbers<[1], [0], [0], [1], [0, 0, 1, 1], [], []>} : vector<128x128xbf16>, vector<128x128xbf16>, vector<128x128xf32> -> vector<128x128xf32>
      %25 = arith.truncf %24 : vector<128x128xf32> to vector<128x128xbf16>
      %c0_19 = arith.constant 0 : index
      %c0_20 = arith.constant 0 : index
      %26 = vector.load %arg8[%c0_19, %c0_20] : memref<128x128xbf16, #tpu.memory_space<vmem>>, vector<128x128xbf16>
      tpu.vector_store %arg8[%c0_19, %c0_20], %25 {strides = array<i32>} : memref<128x128xbf16, #tpu.memory_space<vmem>>, vector<128x128xbf16>,
    } else {
    }
    %c0_i32_1 = arith.constant 0 : i32
    %3 = arith.cmpi sgt, %arg0, %c0_i32_1 : i32
    %4 = arith.extui %3 : i1 to i32
    %c0_i32_2 = arith.constant 0 : i32
    %5 = arith.cmpi ne, %4, %c0_i32_2 : i32
    scf.if %5 {
      %c0_14 = arith.constant 0 : index
      %c0_15 = arith.constant 0 : index
      %22 = vector.load %arg7[%c0_14, %c0_15] : memref<128x128xf32, #tpu.memory_space<vmem>>, vector<128x128xf32>
      %23 = arith.truncf %22 : vector<128x128xf32> to vector<128x128xbf16>
      %c0_16 = arith.constant 0 : index
      %c0_17 = arith.constant 0 : index
      %c0_18 = arith.constant 0 : index
      %24 = vector.load %arg5[%c0_16, %c0_17, %c0_18] : memref<1x128x128xbf16, #tpu.memory_space<vmem>>, vector<1x128x128xbf16>
      %25 = vector.shape_cast %24 : vector<1x128x128xbf16> to vector<128x128xbf16>
      %cst_19 = arith.constant dense<0.000000e+00> : vector<128x128xf32>
      %26 = tpu.matmul %23, %25, %cst_19 {dimension_numbers = #tpu.dot_dimension_numbers<[1], [0], [0], [1], [0, 0, 1, 1], [], []>} : vector<128x128xbf16>, vector<128x128xbf16>, vector<128x128xf32> -> vector<128x128xf32>
      %27 = arith.truncf %26 : vector<128x128xf32> to vector<128x128xbf16>
      %c0_20 = arith.constant 0 : index
      %c0_21 = arith.constant 0 : index
      %28 = vector.load %arg8[%c0_20, %c0_21] : memref<128x128xbf16, #tpu.memory_space<vmem>>, vector<128x128xbf16>
      tpu.vector_store %arg8[%c0_20, %c0_21], %27 {strides = array<i32>} : memref<128x128xbf16, #tpu.memory_space<vmem>>, vector<128x128xbf16>,
    } else {
    }
    %c0 = arith.constant 0 : index
    %c0_3 = arith.constant 0 : index
    %6 = vector.load %arg1[%c0, %c0_3] : memref<128x128xbf16, #tpu.memory_space<vmem>>, vector<128x128xbf16>
    %c0_4 = arith.constant 0 : index
    %c0_5 = arith.constant 0 : index
    %7 = vector.load %arg8[%c0_4, %c0_5] : memref<128x128xbf16, #tpu.memory_space<vmem>>, vector<128x128xbf16>
    %cst = arith.constant dense<0.000000e+00> : vector<128x128xf32>
    %8 = tpu.matmul %6, %7, %cst {dimension_numbers = #tpu.dot_dimension_numbers<[1], [0], [0], [1], [0, 0, 1, 1], [], []>} : vector<128x128xbf16>, vector<128x128xbf16>, vector<128x128xf32> -> vector<128x128xf32>
    %c0_6 = arith.constant 0 : index
    %c0_7 = arith.constant 0 : index
    %9 = vector.load %arg3[%c0_6, %c0_7] : memref<128x1xf32, #tpu.memory_space<vmem>>, vector<128x1xf32>
    %10 = vector.broadcast %9 : vector<128x1xf32> to vector<128x128xf32>
    %11 = arith.mulf %8, %10 : vector<128x128xf32>
    %c0_8 = arith.constant 0 : index
    %c0_9 = arith.constant 0 : index
    %c0_10 = arith.constant 0 : index
    %12 = vector.load %arg6[%c0_8, %c0_9, %c0_10] : memref<1x1x128xf32, #tpu.memory_space<vmem>>, vector<1x1x128xf32>
    %13 = vector.shape_cast %12 : vector<1x1x128xf32> to vector<1x128xf32>
    %14 = vector.broadcast %13 : vector<1x128xf32> to vector<128x128xf32>
    %15 = arith.addf %11, %14 : vector<128x128xf32>
    %c2_i32 = arith.constant 2 : i32
    %16 = arith.cmpi slt, %arg0, %c2_i32 : i32
    %17 = arith.extui %16 : i1 to i32
    %c0_i32_11 = arith.constant 0 : i32
    %18 = arith.cmpi ne, %17, %c0_i32_11 : i32
    scf.if %18 {
      %cst_14 = arith.constant 0.000000e+00 : f32
      %22 = vector.broadcast %cst_14 : f32 to vector<128x128xf32>
      %23 = arith.maximumf %15, %22 : vector<128x128xf32>
      %c0_15 = arith.constant 0 : index
      %c0_16 = arith.constant 0 : index
      %24 = vector.load %arg7[%c0_15, %c0_16] : memref<128x128xf32, #tpu.memory_space<vmem>>, vector<128x128xf32>
      tpu.vector_store %arg7[%c0_15, %c0_16], %23 {strides = array<i32>} : memref<128x128xf32, #tpu.memory_space<vmem>>, vector<128x128xf32>,
    } else {
    }
    %c2_i32_12 = arith.constant 2 : i32
    %19 = arith.cmpi eq, %arg0, %c2_i32_12 : i32
    %20 = arith.extui %19 : i1 to i32
    %c0_i32_13 = arith.constant 0 : i32
    %21 = arith.cmpi ne, %20, %c0_i32_13 : i32
    scf.if %21 {
      %c0_14 = arith.constant 0 : index
      %c0_15 = arith.constant 0 : index
      %22 = vector.load %arg7[%c0_14, %c0_15] : memref<128x128xf32, #tpu.memory_space<vmem>>, vector<128x128xf32>
      tpu.vector_store %arg7[%c0_14, %c0_15], %15 {strides = array<i32>} : memref<128x128xf32, #tpu.memory_space<vmem>>, vector<128x128xf32>,
    } else {
    }
    return
  }
  func.func @transform_0(%arg0: i32) -> (i32, i32) {
    %c0_i32 = arith.constant 0 : i32
    %c0_i32_0 = arith.constant 0 : i32
    %c0_i32_1 = arith.constant 0 : i32
    return %c0_i32, %c0_i32_0 : i32, i32
  }
  func.func @transform_1(%arg0: i32) -> (i32, i32) {
    %c0_i32 = arith.constant 0 : i32
    %c0_i32_0 = arith.constant 0 : i32
    %c0_i32_1 = arith.constant 0 : i32
    return %c0_i32, %c0_i32_0 : i32, i32
  }
  func.func @transform_2(%arg0: i32) -> (i32, i32) {
    %c0_i32 = arith.constant 0 : i32
    %c0_i32_0 = arith.constant 0 : i32
    %c0_i32_1 = arith.constant 0 : i32
    return %c0_i32, %c0_i32_0 : i32, i32
  }
  func.func @transform_3(%arg0: i32) -> (i32, i32) {
    %c0_i32 = arith.constant 0 : i32
    %c0_i32_0 = arith.constant 0 : i32
    %c0_i32_1 = arith.constant 0 : i32
    return %c0_i32, %c0_i32_0 : i32, i32
  }
  func.func @transform_4(%arg0: i32) -> (i32, i32, i32) {
    %c1_i32 = arith.constant 1 : i32
    %0 = arith.subi %arg0, %c1_i32 : i32
    %c0_i32 = arith.constant 0 : i32
    %1 = arith.maxsi %0, %c0_i32 : i32
    %c0_i32_0 = arith.constant 0 : i32
    %c0_i32_1 = arith.constant 0 : i32
    %c0_i32_2 = arith.constant 0 : i32
    return %1, %c0_i32_0, %c0_i32_1 : i32, i32, i32
  }
  func.func @transform_5(%arg0: i32) -> (i32, i32, i32) {
    %c0_i32 = arith.constant 0 : i32
    %c0_i32_0 = arith.constant 0 : i32
    %c0_i32_1 = arith.constant 0 : i32
    return %arg0, %c0_i32, %c0_i32_0 : i32, i32, i32
  }
  func.func @transform_6(%arg0: i32) -> (i32, i32) {
    %c0_i32 = arith.constant 0 : i32
    %c0_i32_0 = arith.constant 0 : i32
    %c0_i32_1 = arith.constant 0 : i32
    return %c0_i32, %c0_i32_0 : i32, i32
  }
}

</mosaic_0001>

<bundles_post_ra>
// kernel: tpu_custom_call.1
= control target key start
LH: loop header
LB: loop body
LE: loop exit
PB: predicated region body
PF: predicated region fallthrough
CT: control target
= control target key end

     0   :  { %11 = vsyncpa [#allocation4], 0  ;;  %s2150_s0 = inlined_call_operand.hbm [shape: bf16[128,128], index: 0, kind: input, shape index: {}]   ;;  %s2151_s1 = inlined_call_operand.hbm [shape: bf16[128,128], index: 1, kind: input, shape index: {}]   ;;  %s2152_s2 = inlined_call_operand.vmem [shape: f32[128,1], index: 2, kind: input, shape index: {}]   ;;  %s2153_s3 = inlined_call_operand.hbm [shape: bf16[128,128], index: 3, kind: input, shape index: {}]   ;;  %s2154_s4 = inlined_call_operand.vmem [shape: bf16[2,128,128], index: 4, kind: input, shape index: {}]   ;;  %s2155_s5 = inlined_call_operand.hbm [shape: f32[3,1,128], index: 5, kind: input, shape index: {}]   ;;  %s2156_s6 = inlined_call_operand.hbm [shape: f32[128,128], index: 6, kind: output, shape index: {}]  }
   0x1   :  { %12 = vsyncpa [#allocation7], 0 }
   0x2   :  { %13 = vsyncpa [#allocation10], 0 }
   0x3   :  { %15 = vsyncpa [#allocation10 + $0x1], 0 }
   0x4   :  { %16 = vsyncpa [#allocation5], 0  ;;  %s1918_s21 = smov 0   ;;  %s1920_s22 = smov 0  }
   0x5   :  { %s1922_s23 = smov 0   ;;  %s1924_s24 = smov 0  }
   0x6 LB: > { %s1939_s25 = sadd.s32 4294967295, %s1872_s24   ;;  %p1198_p0 = scmp.ge.s32.totalorder %s1872_s24, 1  ;;  %s1872_s24 = sphi %s1924_s24, %s2164_s24   ;;  %s1868_s23 = sphi %s1922_s23, %s2163_s23   ;;  %s1864_s22 = sphi %s1920_s22, %s2162_s22   ;;  %s1860_s21 = sphi %s1918_s21, %s2161_s21  }
   0x7   : > { %p159_p1 = scmp.eq.s32.totalorder %s1939_s25, 0  ;;  %p190_p2 = scmp.lt.s32.totalorder %s1872_s24, 4 }
   0x8   : > { %p1199_p3 = scmp.ne.s32.totalorder %s1939_s25, 0  ;;  %s215_s28 = sshll.u32 %s2151_s1, 4  ;;  %s216_s28 = int_to_ptr.hbm [resolvable:$true] %s215_s28 }
   0x9   : > { %p1948_p4 = pnand %p1198_p0, %p190_p2  ;;  %s1874_s30 = smov [#allocation6]  }
   0xa   : > { %s217_s7 = sshll.u32 %s1874_s30, 4  ;;  %s201_s10 = sshll.u32 %s2150_s0, 4  ;;  %s218_s7 = int_to_ptr.vmem [resolvable:$true] %s217_s7  ;;  %s202_s10 = int_to_ptr.hbm [resolvable:$true] %s201_s10 }
   0xb   : > { %p1610_p5 = pneg %p1948_p4  ;;  %s232_s14 = sshll.u32 %s2153_s3, 4  ;;  %s233_s14 = int_to_ptr.hbm [resolvable:$true] %s232_s14 }
   0xc   : > { %s1875_s15 = smov [#allocation3]   ;;  %s1876_s17 = smov 64  }
   0xd   : > { %p1959_p6 = pnand %p1610_p5, %p159_p1  ;;  %s203_s16 = sshll.u32 %s1875_s15, 4  ;;  %s204_s16 = int_to_ptr.vmem [resolvable:$true] %s203_s16 }
   0xe   : > { %s1877_s18 = smov 4   ;;  %s1878_s19 = smov [#allocation8]  }
   0xf   : > { %1616 = dma.hbm_to_vmem [thread:$0]  (!%p1959_p6), %s216_s28, 1024, %s218_s7, [#allocation7], %s1876_s17, %s1876_s17, %s1877_s18  }
  0x10   : > { %1613 = dma.hbm_to_vmem [thread:$0]  (!%p1959_p6), %s202_s10, 1024, %s204_s16, [#allocation4], %s1876_s17, %s1876_s17, %s1877_s18  }
  0x11   : > { %s234_s20 = sshll.u32 %s1878_s19, 4  ;;  %s1973_s26 = sadd.s32 1, %s1872_s24   ;;  %s235_s20 = int_to_ptr.vmem [resolvable:$true] %s234_s20 }
  0x12   : > { %1619 = dma.hbm_to_vmem [thread:$0]  (!%p1959_p6), %s233_s14, 1024, %s235_s20, [#allocation7], %s1876_s17, %s1876_s17, %s1877_s18  }
  0x13   : > { %s142_s27 = ssub.s32 %s1872_s24, %s1973_s26  ;;  %s145_s30 = sadd.s32 1, %s1868_s23 }
  0x14   : > { %p143_p7 = scmp.eq.s32.totalorder %s142_s27, 0  ;;  %p152_p8 = scmp.ne.s32.totalorder %s1868_s23, %s1864_s22 }
  0x15   : > { %p153_p9 = scmp.eq.s32.totalorder %s1872_s24, 0  ;;  %p158_p10 = scmp.ne.s32.totalorder %s1864_s22, %s1860_s21 }
  0x16   : > { %s1984_s28 = scalar_select %p143_p7, %s1868_s23, %s145_s30  }
  0x17   : > { %p154_p11 = por %p153_p9, %p152_p8  ;;  %p1988_p12 = por %p159_p1, %p158_p10 }
  0x18   : > { %p1627_p13 = scmp.lt.s32.totalorder %s1872_s24, 3  ;;  %s262_s8 = sand.u32 1, %s1868_s23  }
  0x19   : > { %s268_s11 = scalar_lea.hbm %s2155_s5, %s1872_s24  ;;  %s265_s12 = scalar_lea.vmem [#allocation9], %s262_s8 }
  0x1a   : > { %s272_s13 = sshll.u32 %s265_s12, 4  ;;  %s270_s14 = sshll.u32 %s268_s11, 4  ;;  %s273_s13 = int_to_ptr.vmem [resolvable:$true] %s272_s13  ;;  %s271_s14 = int_to_ptr.hbm [resolvable:$true] %s270_s14 }
  0x1b   : > { %p1998_p0 = pnand %p1627_p13, %p154_p11  ;;  %s263_s15 = scalar_lea.sflag [#allocation10], %s262_s8 }
  0x1c   : > { %s1768_s16 = sshra.s32 %s271_s14, 4  ;;  %s1775_s19 = scalar_lea.hbm %s2155_s5, 3  ;;  %s1769_s16 = int_to_ptr.hbm [resolvable:$true] %s1768_s16 }
  0x1d   : > { %s1770_s17 = scalar_lea.hbm %s1769_s16, 1  ;;  %p1772_p5 = pneg %p1998_p0 }
  0x1e   : > { %p1771_p2 = scmp.ne.s32.totalorder %s1769_s16, %s1770_s17  ;;  %p1776_p8 = scmp.lt.s32.totalorder %s1769_s16, %s2155_s5 }
  0x1f   : > { %p1777_p9 = scmp.lt.s32.totalorder %s1775_s19, %s1770_s17 }
  0x20   : > { %p1773_p6 = pnand %p1772_p5, %p1771_p2 }
  0x21   : > { %p1778_p10 = por %p1777_p9, %p1776_p8 }
  0x22   : > { %p1774_p7 = pneg %p1773_p6 }
  0x24   : > { %p1779_p11 = pnand %p1778_p10, %p1774_p7 }
  0x26   : > { %1782 = shalt.err (!%p1779_p11)
}
  0x27   : > { %1623 = dma.hbm_to_vmem [thread:$0]  (!%p1998_p0), %s271_s14, 16, %s273_s13, %s263_s15  }
  0x28   : > { %281 = sbr.rel (%p1948_p4) target bundleno = 696 (0x2b8), region = 44 }
  0x2d   : > { %1843 = dma.done.wait (%p159_p1), [#allocation4], 1024  }
  0x2e   : > { %1845 = vsyncadd (%p159_p1), [#allocation4], 4294966272 }
  0x2f   : > { %1847 = dma.done.wait (%p159_p1), [#allocation7], 2048  }
  0x30   : > { %1849 = vsyncadd (%p159_p1), [#allocation7], 4294965248  ;;  %s298_s30 = sand.u32 1, %s1864_s22  }
  0x31   : > { %s299_s8 = scalar_lea.sflag [#allocation10], %s298_s30  ;;  %s2023_s9 = scalar_lea.vmem [#allocation9], %s298_s30 }
  0x32   : > { %1851 = dma.done.wait (%p1988_p12), %s299_s8, 16  }
  0x33   : > { %1853 = vsyncadd (%p1988_p12), %s299_s8, 4294967280  ;;  %s1207_s29 = sadd.s32 4294967295, %s1939_s25 }
  0x34   : > { %p334_p4 = scmp.gt.s32.totalorder %s1207_s29, 0  ;;  %p1208_p13 = scmp.lt.s32.totalorder %s1207_s29, 1 }
  0x35   : > { %347 = sbr.rel (%p1199_p3) target bundleno = 251 (0xfb), region = 64 }
  0x36   : > { %s2166_s29 = smov (!%p334_p4, %s1207_s29), 0 }
  0x37   : > { %s2168_s29 = smov (!%p1208_p13, %s2166_s29), 1 }
  0x38   : > { %s1385_s10 = sshll.u32 %s2168_s29, 6 }
  0x39   : > { %s2033_s13 = scalar_lea.vmem %s2154_s4, %s1385_s10 }
  0x3a   : > { %v1401_v0 = vld [vmem:[#allocation8 + $0x38] sm:$0xff]  ;;  %v1400_v1 = vld [vmem:[#allocation8 + $0x30] sm:$0xff]  ;;  %v1399_v2 = vld [vmem:[#allocation8 + $0x28] sm:$0xff] }
  0x3b   : > { %476 = vmatpush.bf16.msra.mxu0 %v1401_v0  ;;  %1520 = vmatpush.bf16.msra.mxu1 %v1401_v0  ;;  %v1398_v3 = vld [vmem:[#allocation8 + $0x20] sm:$0xff]  ;;  %v1397_v4 = vld [vmem:[#allocation8 + $0x18] sm:$0xff]  ;;  %v1396_v5 = vld [vmem:[#allocation8 + $0x10] sm:$0xff] }
  0x3c   : > { %1521 = vmatpush.bf16.msra.mxu2 %v1401_v0  ;;  %1522 = vmatpush.bf16.msra.mxu3 %v1401_v0  ;;  %v1395_v6 = vld [vmem:[#allocation8 + $0x8] sm:$0xff]  ;;  %v1394_v7 = vld [vmem:[#allocation8] sm:$0xff]  ;;  %v1388_v9 = vld [vmem:[#allocation6 + $0x10] sm:$0xff] }
  0x3d   : > { %v1386_v8 = vld [vmem:[#allocation6] sm:$0xff]  ;;  %v1392_v11 = vld [vmem:[#allocation6 + $0x30] sm:$0xff]  ;;  %v1387_v12 = vld [vmem:[#allocation6 + $0x8] sm:$0xff] }
  0x3e   : > { %v1390_v10 = vld [vmem:[#allocation6 + $0x20] sm:$0xff]  ;;  %v1389_v13 = vld [vmem:[#allocation6 + $0x18] sm:$0xff]  ;;  %v1391_v14 = vld [vmem:[#allocation6 + $0x28] sm:$0xff] }
  0x3f   : > { %477 = vmatpush.bf16.msra.mxu0 %v1400_v1  ;;  %1523 = vmatpush.bf16.msra.mxu1 %v1400_v1  ;;  %v1393_v15 = vld [vmem:[#allocation6 + $0x38] sm:$0xff] }
  0x40   : > { %1524 = vmatpush.bf16.msra.mxu2 %v1400_v1  ;;  %1525 = vmatpush.bf16.msra.mxu3 %v1400_v1 }
  0x43   : > { %478 = vmatpush.bf16.msra.mxu0 %v1399_v2  ;;  %1526 = vmatpush.bf16.msra.mxu1 %v1399_v2 }
  0x44   : > { %1527 = vmatpush.bf16.msra.mxu2 %v1399_v2  ;;  %1528 = vmatpush.bf16.msra.mxu3 %v1399_v2 }
  0x47   : > { %479 = vmatpush.bf16.msra.mxu0 %v1398_v3  ;;  %1529 = vmatpush.bf16.msra.mxu1 %v1398_v3 }
  0x48   : > { %1530 = vmatpush.bf16.msra.mxu2 %v1398_v3  ;;  %1531 = vmatpush.bf16.msra.mxu3 %v1398_v3 }
  0x4b   : > { %480 = vmatpush.bf16.msra.mxu0 %v1397_v4  ;;  %1532 = vmatpush.bf16.msra.mxu1 %v1397_v4 }
  0x4c   : > { %1533 = vmatpush.bf16.msra.mxu2 %v1397_v4  ;;  %1534 = vmatpush.bf16.msra.mxu3 %v1397_v4 }
  0x4f   : > { %481 = vmatpush.bf16.msra.mxu0 %v1396_v5  ;;  %1535 = vmatpush.bf16.msra.mxu1 %v1396_v5 }
  0x50   : > { %1536 = vmatpush.bf16.msra.mxu2 %v1396_v5  ;;  %1537 = vmatpush.bf16.msra.mxu3 %v1396_v5 }
  0x53   : > { %482 = vmatpush.bf16.msra.mxu0 %v1395_v6  ;;  %1538 = vmatpush.bf16.msra.mxu1 %v1395_v6 }
  0x54   : > { %1539 = vmatpush.bf16.msra.mxu2 %v1395_v6  ;;  %1540 = vmatpush.bf16.msra.mxu3 %v1395_v6 }
  0x57   : > { %483 = vmatpush.bf16.msra.mxu0 %v1394_v7  ;;  %1541 = vmatpush.bf16.msra.mxu1 %v1394_v7 }
  0x58   : > { %1542 = vmatpush.bf16.msra.mxu2 %v1394_v7  ;;  %1543 = vmatpush.bf16.msra.mxu3 %v1394_v7 }
  0x5a   : > { %484 = vmatmul.bf16.vlgmr.msra.gmra.mxu0 %v1386_v8  ;;  %494 = vmatmul.bf16.vlgmr.msra.gmra.mxu1 %v1388_v9 }
  0x5b   : > { %504 = vmatmul.bf16.vlgmr.msra.gmra.mxu2 %v1390_v10  ;;  %514 = vmatmul.bf16.vlgmr.msra.gmra.mxu3 %v1392_v11 }
  0x6a   : > { %489 = vmatmul.bf16.gmra.mxu0 %v1387_v12  ;;  %499 = vmatmul.bf16.gmra.mxu1 %v1389_v13 }
  0x6b   : > { %509 = vmatmul.bf16.gmra.mxu2 %v1391_v14  ;;  %519 = vmatmul.bf16.gmra.mxu3 %v1393_v15 }
  0xd7   : > { %v485_v16 = vpop.f32.mrf.mxu0  ;;  %v495_v17 = vpop.f32.mrf.mxu1 }
  0xde   : > { %v505_v18 = vpop.f32.mrf.mxu2  ;;  %v515_v19 = vpop.f32.mrf.mxu3 }
  0xdf   : > { %v487_v20 = vpop.f32.mrf.mxu0  ;;  %v497_v21 = vpop.f32.mrf.mxu1 }
  0xe0   : > { %v1429_v22 = vpack.c.bf16 %v487_v20, %v485_v16  ;;  %v1439_v23 = vpack.c.bf16 %v497_v21, %v495_v17 }
  0xe2   : > { %1430 = vst [vmem:[#allocation2 + $0x30] sm:$0xff] %v1429_v22  }
  0xe3   : > { %1507 = vst [vmem:[#allocation2 + $0x18] sm:$0xff] %v1439_v23  }
  0xe6   : > { %v507_v24 = vpop.f32.mrf.mxu2  ;;  %v517_v25 = vpop.f32.mrf.mxu3 }
  0xe7   : > { %v1449_v26 = vpack.c.bf16 %v507_v24, %v505_v18  ;;  %v1459_v27 = vpack.c.bf16 %v517_v25, %v515_v19  ;;  %v490_v28 = vpop.f32.mrf.mxu0  ;;  %v500_v29 = vpop.f32.mrf.mxu1 }
  0xe9   : > { %1509 = vst [vmem:[#allocation2 + $0x8] sm:$0xff] %v1449_v26  }
  0xea   : > { %1511 = vst [vmem:[#allocation2 + $0x28] sm:$0xff] %v1459_v27  }
  0xee   : > { %v510_v30 = vpop.f32.mrf.mxu2  ;;  %v520_v31 = vpop.f32.mrf.mxu3 }
  0xef   : > { %v492_v32 = vpop.f32.mrf.mxu0  ;;  %v502_v33 = vpop.f32.mrf.mxu1 }
  0xf0   : > { %v1434_v34 = vpack.c.bf16 %v492_v32, %v490_v28  ;;  %v1444_v35 = vpack.c.bf16 %v502_v33, %v500_v29 }
  0xf2   : > { %1506 = vst [vmem:[#allocation2] sm:$0xff] %v1434_v34  }
  0xf3   : > { %1508 = vst [vmem:[#allocation2 + $0x10] sm:$0xff] %v1444_v35  }
  0xf6   : > { %v512_v36 = vpop.f32.mrf.mxu2  ;;  %v522_v37 = vpop.f32.mrf.mxu3 }
  0xf7   : > { %v1454_v38 = vpack.c.bf16 %v512_v36, %v510_v30  ;;  %v1464_v39 = vpack.c.bf16 %v522_v37, %v520_v31 }
  0xf9   : > { %1510 = vst [vmem:[#allocation2 + $0x20] sm:$0xff] %v1454_v38  }
  0xfa   : > { %1512 = vst [vmem:[#allocation2 + $0x38] sm:$0xff] %v1464_v39  }
  0xfb PF: > { %p1280_p1 = scmp.le.s32.totalorder %s1939_s25, 0 }
  0xfd   : > { %560 = sbr.rel (%p1280_p1) target bundleno = 451 (0x1c3), region = 68 }
 0x102   : > { %v1409_v40 = vld [vmem:[%s2033_s13 + $0x38] sm:$0xff]  ;;  %v1408_v41 = vld [vmem:[%s2033_s13 + $0x30] sm:$0xff]  ;;  %v1407_v42 = vld [vmem:[%s2033_s13 + $0x28] sm:$0xff] }
 0x103   : > { %649 = vmatpush.bf16.msra.mxu0 %v1409_v40  ;;  %1544 = vmatpush.bf16.msra.mxu1 %v1409_v40  ;;  %v1406_v43 = vld [vmem:[%s2033_s13 + $0x20] sm:$0xff]  ;;  %v1405_v44 = vld [vmem:[%s2033_s13 + $0x18] sm:$0xff]  ;;  %v1404_v45 = vld [vmem:[%s2033_s13 + $0x10] sm:$0xff] }
 0x104   : > { %1545 = vmatpush.bf16.msra.mxu2 %v1409_v40  ;;  %1546 = vmatpush.bf16.msra.mxu3 %v1409_v40  ;;  %v1403_v46 = vld [vmem:[%s2033_s13 + $0x8] sm:$0xff]  ;;  %v1402_v47 = vld [vmem:[%s2033_s13] sm:$0xff]  ;;  %v563_v60 = vld [vmem:[#allocation11 + $0x10] sm:$0xff] }
 0x105   : > { %v561_v48 = vld [vmem:[#allocation11] sm:$0xff]  ;;  %v562_v49 = vld [vmem:[#allocation11 + $0x8] sm:$0xff]  ;;  %v564_v61 = vld [vmem:[#allocation11 + $0x18] sm:$0xff] }
 0x106   : > { %v565_v50 = vld [vmem:[#allocation11 + $0x20] sm:$0xff]  ;;  %v566_v51 = vld [vmem:[#allocation11 + $0x28] sm:$0xff]  ;;  %v577_v56 = vpack.c.bf16 %v562_v49, %v561_v48  ;;  %v567_v62 = vld [vmem:[#allocation11 + $0x30] sm:$0xff]  ;;  %v578_v4 = vpack.c.bf16 %v564_v61, %v563_v60 }
 0x107   : > { %650 = vmatpush.bf16.msra.mxu0 %v1408_v41  ;;  %1547 = vmatpush.bf16.msra.mxu1 %v1408_v41  ;;  %v569_v52 = vld [vmem:[#allocation11 + $0x40] sm:$0xff]  ;;  %v570_v53 = vld [vmem:[#allocation11 + $0x48] sm:$0xff]  ;;  %v579_v57 = vpack.c.bf16 %v566_v51, %v565_v50  ;;  %v568_v63 = vld [vmem:[#allocation11 + $0x38] sm:$0xff] }
 0x108   : > { %1548 = vmatpush.bf16.msra.mxu2 %v1408_v41  ;;  %1549 = vmatpush.bf16.msra.mxu3 %v1408_v41  ;;  %v573_v54 = vld [vmem:[#allocation11 + $0x60] sm:$0xff]  ;;  %v574_v55 = vld [vmem:[#allocation11 + $0x68] sm:$0xff]  ;;  %v581_v58 = vpack.c.bf16 %v570_v53, %v569_v52  ;;  %v571_v0 = vld [vmem:[#allocation11 + $0x50] sm:$0xff]  ;;  %v580_v5 = vpack.c.bf16 %v568_v63, %v567_v62 }
 0x109   : > { %v583_v59 = vpack.c.bf16 %v574_v55, %v573_v54  ;;  %v572_v1 = vld [vmem:[#allocation11 + $0x58] sm:$0xff]  ;;  %v575_v2 = vld [vmem:[#allocation11 + $0x70] sm:$0xff] }
 0x10a   : > { %v576_v3 = vld [vmem:[#allocation11 + $0x78] sm:$0xff]  ;;  %v582_v6 = vpack.c.bf16 %v572_v1, %v571_v0 }
 0x10b   : > { %651 = vmatpush.bf16.msra.mxu0 %v1407_v42  ;;  %1550 = vmatpush.bf16.msra.mxu1 %v1407_v42  ;;  %v584_v7 = vpack.c.bf16 %v576_v3, %v575_v2 }
 0x10c   : > { %1551 = vmatpush.bf16.msra.mxu2 %v1407_v42  ;;  %1552 = vmatpush.bf16.msra.mxu3 %v1407_v42 }
 0x10f   : > { %652 = vmatpush.bf16.msra.mxu0 %v1406_v43  ;;  %1553 = vmatpush.bf16.msra.mxu1 %v1406_v43 }
 0x110   : > { %1554 = vmatpush.bf16.msra.mxu2 %v1406_v43  ;;  %1555 = vmatpush.bf16.msra.mxu3 %v1406_v43 }
 0x113   : > { %653 = vmatpush.bf16.msra.mxu0 %v1405_v44  ;;  %1556 = vmatpush.bf16.msra.mxu1 %v1405_v44 }
 0x114   : > { %1557 = vmatpush.bf16.msra.mxu2 %v1405_v44  ;;  %1558 = vmatpush.bf16.msra.mxu3 %v1405_v44 }
 0x117   : > { %654 = vmatpush.bf16.msra.mxu0 %v1404_v45  ;;  %1559 = vmatpush.bf16.msra.mxu1 %v1404_v45 }
 0x118   : > { %1560 = vmatpush.bf16.msra.mxu2 %v1404_v45  ;;  %1561 = vmatpush.bf16.msra.mxu3 %v1404_v45 }
 0x11b   : > { %655 = vmatpush.bf16.msra.mxu0 %v1403_v46  ;;  %1562 = vmatpush.bf16.msra.mxu1 %v1403_v46 }
 0x11c   : > { %1563 = vmatpush.bf16.msra.mxu2 %v1403_v46  ;;  %1564 = vmatpush.bf16.msra.mxu3 %v1403_v46 }
 0x11f   : > { %656 = vmatpush.bf16.msra.mxu0 %v1402_v47  ;;  %1565 = vmatpush.bf16.msra.mxu1 %v1402_v47 }
 0x120   : > { %1566 = vmatpush.bf16.msra.mxu2 %v1402_v47  ;;  %1567 = vmatpush.bf16.msra.mxu3 %v1402_v47 }
 0x122   : > { %657 = vmatmul.bf16.vlgmr.msra.gmra.mxu0 %v577_v56  ;;  %667 = vmatmul.bf16.vlgmr.msra.gmra.mxu1 %v579_v57 }
 0x123   : > { %677 = vmatmul.bf16.vlgmr.msra.gmra.mxu2 %v581_v58  ;;  %687 = vmatmul.bf16.vlgmr.msra.gmra.mxu3 %v583_v59 }
 0x132   : > { %662 = vmatmul.bf16.gmra.mxu0 %v578_v4  ;;  %672 = vmatmul.bf16.gmra.mxu1 %v580_v5 }
 0x133   : > { %682 = vmatmul.bf16.gmra.mxu2 %v582_v6  ;;  %692 = vmatmul.bf16.gmra.mxu3 %v584_v7 }
 0x19f   : > { %v658_v8 = vpop.f32.mrf.mxu0  ;;  %v668_v9 = vpop.f32.mrf.mxu1 }
 0x1a6   : > { %v678_v10 = vpop.f32.mrf.mxu2  ;;  %v688_v11 = vpop.f32.mrf.mxu3 }
 0x1a7   : > { %v660_v12 = vpop.f32.mrf.mxu0  ;;  %v670_v13 = vpop.f32.mrf.mxu1 }
 0x1a8   : > { %v1469_v14 = vpack.c.bf16 %v660_v12, %v658_v8  ;;  %v1479_v15 = vpack.c.bf16 %v670_v13, %v668_v9 }
 0x1aa   : > { %1470 = vst [vmem:[#allocation2 + $0x30] sm:$0xff] %v1469_v14  }
 0x1ab   : > { %1514 = vst [vmem:[#allocation2 + $0x18] sm:$0xff] %v1479_v15  }
 0x1ae   : > { %v680_v16 = vpop.f32.mrf.mxu2  ;;  %v690_v17 = vpop.f32.mrf.mxu3 }
 0x1af   : > { %v1489_v18 = vpack.c.bf16 %v680_v16, %v678_v10  ;;  %v1499_v19 = vpack.c.bf16 %v690_v17, %v688_v11  ;;  %v663_v20 = vpop.f32.mrf.mxu0  ;;  %v673_v21 = vpop.f32.mrf.mxu1 }
 0x1b1   : > { %1516 = vst [vmem:[#allocation2 + $0x8] sm:$0xff] %v1489_v18  }
 0x1b2   : > { %1518 = vst [vmem:[#allocation2 + $0x28] sm:$0xff] %v1499_v19  }
 0x1b6   : > { %v683_v22 = vpop.f32.mrf.mxu2  ;;  %v693_v23 = vpop.f32.mrf.mxu3 }
 0x1b7   : > { %v665_v24 = vpop.f32.mrf.mxu0  ;;  %v675_v25 = vpop.f32.mrf.mxu1 }
 0x1b8   : > { %v1474_v26 = vpack.c.bf16 %v665_v24, %v663_v20  ;;  %v1484_v27 = vpack.c.bf16 %v675_v25, %v673_v21 }
 0x1ba   : > { %1513 = vst [vmem:[#allocation2] sm:$0xff] %v1474_v26  }
 0x1bb   : > { %1515 = vst [vmem:[#allocation2 + $0x10] sm:$0xff] %v1484_v27  }
 0x1be   : > { %v685_v28 = vpop.f32.mrf.mxu2  ;;  %v695_v29 = vpop.f32.mrf.mxu3 }
 0x1bf   : > { %v1494_v30 = vpack.c.bf16 %v685_v28, %v683_v22  ;;  %v1504_v31 = vpack.c.bf16 %v695_v29, %v693_v23 }
 0x1c1   : > { %1517 = vst [vmem:[#allocation2 + $0x20] sm:$0xff] %v1494_v30  }
 0x1c2   : > { %1519 = vst [vmem:[#allocation2 + $0x38] sm:$0xff] %v1504_v31  }
 0x1c3 PF: > { %v907_v32 = vld [vmem:[%s2152_s2] sm:$0xff]  ;;  %v1879_v34 = vmov 0   ;;  %v909_v35 = vld [vmem:[%s2152_s2 + $0x10] sm:$0xff]  ;;  %v1424_v36 = vld [vmem:[#allocation2 + $0x28] sm:$0xff]  ;;  %p1377_p3 = scmp.ge.s32.totalorder %s1939_s25, 2 }
 0x1c4   : > { %1674 = vset.pattern.permute.xlu0 %v1879_v34  ;;  %1675 = vset.pattern.permute.xlu1 %v1879_v34  ;;  %v911_v38 = vld [vmem:[%s2152_s2 + $0x20] sm:$0xff]  ;;  %v908_v39 = vld [vmem:[%s2152_s2 + $0x8] sm:$0xff]  ;;  %v910_v40 = vld [vmem:[%s2152_s2 + $0x18] sm:$0xff] }
 0x1c5   : > { %925 = vperm.xlu0 %1674, %v907_v32   ;;  %935 = vperm.xlu1 %1675, %v909_v35   ;;  %v1422_v41 = vld [vmem:[#allocation2 + $0x8] sm:$0xff]  ;;  %v1421_v43 = vld [vmem:[#allocation2 + $0x10] sm:$0xff]  ;;  %v914_v45 = vld [vmem:[%s2152_s2 + $0x38] sm:$0xff] }
 0x1c6   : > { %1676 = vset.pattern.permute.xlu2 %v1879_v34  ;;  %v912_v42 = vld [vmem:[%s2152_s2 + $0x28] sm:$0xff]  ;;  %v913_v44 = vld [vmem:[%s2152_s2 + $0x30] sm:$0xff]  ;;  %v1420_v46 = vld [vmem:[#allocation2 + $0x18] sm:$0xff] }
 0x1c7   : > { %945 = vperm.xlu2 %1676, %v911_v38   ;;  %v915_v47 = vld [vmem:[%s2152_s2 + $0x40] sm:$0xff]  ;;  %v916_v49 = vld [vmem:[%s2152_s2 + $0x48] sm:$0xff]  ;;  %v917_v50 = vld [vmem:[%s2152_s2 + $0x50] sm:$0xff] }
 0x1c8   : > { %v1423_v37 = vld [vmem:[#allocation2 + $0x20] sm:$0xff]  ;;  %v1418_v51 = vld [vmem:[#allocation2 + $0x30] sm:$0xff]  ;;  %v918_v53 = vld [vmem:[%s2152_s2 + $0x58] sm:$0xff] }
 0x1c9   : > { %v1425_v33 = vld [vmem:[#allocation2 + $0x38] sm:$0xff]  ;;  %v1419_v48 = vld [vmem:[#allocation2] sm:$0xff]  ;;  %v1412_v54 = vld [vmem:[#allocation3 + $0x10] sm:$0xff] }
 0x1ca   : > { %858 = vmatpush.bf16.msra.mxu0 %v1425_v33  ;;  %1568 = vmatpush.bf16.msra.mxu1 %v1425_v33  ;;  %v1410_v52 = vld [vmem:[#allocation3] sm:$0xff]  ;;  %v1416_v57 = vld [vmem:[#allocation3 + $0x30] sm:$0xff]  ;;  %v920_v58 = vld [vmem:[%s2152_s2 + $0x68] sm:$0xff] }
 0x1cb   : > { %1569 = vmatpush.bf16.msra.mxu2 %v1425_v33  ;;  %1570 = vmatpush.bf16.msra.mxu3 %v1425_v33  ;;  %v919_v55 = vld [vmem:[%s2152_s2 + $0x60] sm:$0xff]  ;;  %v921_v59 = vld [vmem:[%s2152_s2 + $0x70] sm:$0xff]  ;;  %v922_v60 = vld [vmem:[%s2152_s2 + $0x78] sm:$0xff] }
 0x1cc   : > { %v1414_v56 = vld [vmem:[#allocation3 + $0x20] sm:$0xff]  ;;  %v1411_v61 = vld [vmem:[#allocation3 + $0x8] sm:$0xff]  ;;  %v1413_v62 = vld [vmem:[#allocation3 + $0x18] sm:$0xff] }
 0x1cd   : > { %930 = vperm.xlu0 %1674, %v908_v39   ;;  %940 = vperm.xlu1 %1675, %v910_v40   ;;  %v1415_v63 = vld [vmem:[#allocation3 + $0x28] sm:$0xff]  ;;  %v1417_v0 = vld [vmem:[#allocation3 + $0x38] sm:$0xff]  ;;  %v1677_v10 = vld [vmem:[%s2023_s9] ss:$0 sm:$0xff] }
 0x1ce   : > { %859 = vmatpush.bf16.msra.mxu0 %v1424_v36  ;;  %1571 = vmatpush.bf16.msra.mxu1 %v1424_v36 }
 0x1cf   : > { %1572 = vmatpush.bf16.msra.mxu2 %v1424_v36  ;;  %1573 = vmatpush.bf16.msra.mxu3 %v1424_v36 }
 0x1d0   : > { %950 = vperm.xlu2 %1676, %v912_v42  }
 0x1d2   : > { %860 = vmatpush.bf16.msra.mxu0 %v1423_v37  ;;  %1574 = vmatpush.bf16.msra.mxu1 %v1423_v37 }
 0x1d3   : > { %1575 = vmatpush.bf16.msra.mxu2 %v1423_v37  ;;  %1576 = vmatpush.bf16.msra.mxu3 %v1423_v37 }
 0x1d5   : > { %955 = vperm.xlu0 %1674, %v913_v44   ;;  %960 = vperm.xlu1 %1675, %v914_v45  }
 0x1d6   : > { %861 = vmatpush.bf16.msra.mxu0 %v1422_v41  ;;  %1577 = vmatpush.bf16.msra.mxu1 %v1422_v41 }
 0x1d7   : > { %1578 = vmatpush.bf16.msra.mxu2 %v1422_v41  ;;  %1579 = vmatpush.bf16.msra.mxu3 %v1422_v41 }
 0x1d8   : > { %965 = vperm.xlu2 %1676, %v915_v47  }
 0x1da   : > { %862 = vmatpush.bf16.msra.mxu0 %v1421_v43  ;;  %1580 = vmatpush.bf16.msra.mxu1 %v1421_v43 }
 0x1db   : > { %1581 = vmatpush.bf16.msra.mxu2 %v1421_v43  ;;  %1582 = vmatpush.bf16.msra.mxu3 %v1421_v43 }
 0x1dd   : > { %970 = vperm.xlu0 %1674, %v916_v49   ;;  %975 = vperm.xlu1 %1675, %v917_v50  }
 0x1de   : > { %863 = vmatpush.bf16.msra.mxu0 %v1420_v46  ;;  %1583 = vmatpush.bf16.msra.mxu1 %v1420_v46 }
 0x1df   : > { %1584 = vmatpush.bf16.msra.mxu2 %v1420_v46  ;;  %1585 = vmatpush.bf16.msra.mxu3 %v1420_v46 }
 0x1e0   : > { %980 = vperm.xlu2 %1676, %v918_v53  }
 0x1e2   : > { %864 = vmatpush.bf16.msra.mxu0 %v1419_v48  ;;  %1586 = vmatpush.bf16.msra.mxu1 %v1419_v48 }
 0x1e3   : > { %1587 = vmatpush.bf16.msra.mxu2 %v1419_v48  ;;  %1588 = vmatpush.bf16.msra.mxu3 %v1419_v48 }
 0x1e5   : > { %985 = vperm.xlu0 %1674, %v919_v55   ;;  %990 = vperm.xlu1 %1675, %v920_v58  }
 0x1e6   : > { %865 = vmatpush.bf16.msra.mxu0 %v1418_v51  ;;  %1589 = vmatpush.bf16.msra.mxu1 %v1418_v51 }
 0x1e7   : > { %1590 = vmatpush.bf16.msra.mxu2 %v1418_v51  ;;  %1591 = vmatpush.bf16.msra.mxu3 %v1418_v51 }
 0x1e8   : > { %995 = vperm.xlu2 %1676, %v921_v59  }
 0x1e9   : > { %866 = vmatmul.bf16.vlgmr.msra.gmra.mxu0 %v1410_v52  ;;  %876 = vmatmul.bf16.vlgmr.msra.gmra.mxu1 %v1412_v54 }
 0x1ea   : > { %886 = vmatmul.bf16.vlgmr.msra.gmra.mxu2 %v1414_v56  ;;  %896 = vmatmul.bf16.vlgmr.msra.gmra.mxu3 %v1416_v57 }
 0x1ed   : > { %1000 = vperm.xlu0 %1674, %v922_v60  }
 0x1f9   : > { %871 = vmatmul.bf16.gmra.mxu0 %v1411_v61  ;;  %881 = vmatmul.bf16.gmra.mxu1 %v1413_v62 }
 0x1fa   : > { %891 = vmatmul.bf16.gmra.mxu2 %v1415_v63  ;;  %901 = vmatmul.bf16.gmra.mxu3 %v1417_v0 }
 0x221   : > { %v946_v4 = vpop.permute.xlu2 %945 }
 0x22a   : > { %v951_v7 = vpop.permute.xlu2 %950 }
 0x232   : > { %v966_v15 = vpop.permute.xlu2 %965 }
 0x237   : > { %v926_v1 = vpop.permute.xlu0 %925  ;;  %v936_v2 = vpop.permute.xlu1 %935 }
 0x23a   : > { %v981_v32 = vpop.permute.xlu2 %980 }
 0x23f   : > { %v931_v3 = vpop.permute.xlu0 %930  ;;  %v941_v5 = vpop.permute.xlu1 %940 }
 0x242   : > { %v996_v46 = vpop.permute.xlu2 %995 }
 0x247   : > { %v956_v6 = vpop.permute.xlu0 %955  ;;  %v961_v8 = vpop.permute.xlu1 %960 }
 0x24f   : > { %v971_v9 = vpop.permute.xlu0 %970  ;;  %v976_v18 = vpop.permute.xlu1 %975 }
 0x257   : > { %v986_v19 = vpop.permute.xlu0 %985  ;;  %v991_v33 = vpop.permute.xlu1 %990 }
 0x25f   : > { %v1001_v59 = vpop.permute.xlu0 %1000 }
 0x266   : > { %v867_v11 = vpop.f32.mrf.mxu0  ;;  %v877_v13 = vpop.f32.mrf.mxu1 }
 0x267   : > { %v1003_v12 = vmul.f32 %v926_v1, %v867_v11  ;;  %v1007_v14 = vmul.f32 %v946_v4, %v877_v13 }
 0x269   : > { %v2095_v16 = vadd.f32 %v1677_v10, %v1003_v12  ;;  %v2097_v17 = vadd.f32 %v1677_v10, %v1007_v14 }
 0x26d   : > { %v887_v20 = vpop.f32.mrf.mxu2  ;;  %v897_v21 = vpop.f32.mrf.mxu3 }
 0x26e   : > { %v1011_v22 = vmul.f32 %v966_v15, %v887_v20  ;;  %v1015_v23 = vmul.f32 %v986_v19, %v897_v21  ;;  %v869_v24 = vpop.f32.mrf.mxu0  ;;  %v879_v25 = vpop.f32.mrf.mxu1 }
 0x26f   : > { %v1004_v26 = vmul.f32 %v931_v3, %v869_v24  ;;  %v1008_v27 = vmul.f32 %v951_v7, %v879_v25 }
 0x270   : > { %v2099_v28 = vadd.f32 %v1677_v10, %v1011_v22  ;;  %v2101_v29 = vadd.f32 %v1677_v10, %v1015_v23 }
 0x271   : > { %v2103_v30 = vadd.f32 %v1677_v10, %v1004_v26  ;;  %v2105_v31 = vadd.f32 %v1677_v10, %v1008_v27 }
 0x275   : > { %v889_v34 = vpop.f32.mrf.mxu2  ;;  %v899_v35 = vpop.f32.mrf.mxu3 }
 0x276   : > { %v1012_v36 = vmul.f32 %v971_v9, %v889_v34  ;;  %v1016_v37 = vmul.f32 %v991_v33, %v899_v35  ;;  %v872_v38 = vpop.f32.mrf.mxu0  ;;  %v882_v39 = vpop.f32.mrf.mxu1 }
 0x277   : > { %v1005_v40 = vmul.f32 %v936_v2, %v872_v38  ;;  %v1009_v41 = vmul.f32 %v956_v6, %v882_v39 }
 0x278   : > { %v2107_v42 = vadd.f32 %v1677_v10, %v1012_v36  ;;  %v2109_v43 = vadd.f32 %v1677_v10, %v1016_v37 }
 0x279   : > { %v1025_v44 = vadd.f32 %v1677_v10, %v1005_v40  ;;  %v2111_v45 = vadd.f32 %v1677_v10, %v1009_v41 }
 0x27d   : > { %v892_v47 = vpop.f32.mrf.mxu2  ;;  %v902_v48 = vpop.f32.mrf.mxu3 }
 0x27e   : > { %v1013_v49 = vmul.f32 %v976_v18, %v892_v47  ;;  %v1017_v50 = vmul.f32 %v996_v46, %v902_v48  ;;  %v874_v51 = vpop.f32.mrf.mxu0  ;;  %v884_v52 = vpop.f32.mrf.mxu1 }
 0x27f   : > { %v1006_v53 = vmul.f32 %v941_v5, %v874_v51  ;;  %v1010_v54 = vmul.f32 %v961_v8, %v884_v52 }
 0x280   : > { %v1033_v55 = vadd.f32 %v1677_v10, %v1013_v49  ;;  %v1037_v56 = vadd.f32 %v1677_v10, %v1017_v50 }
 0x281   : > { %v1026_v57 = vadd.f32 %v1677_v10, %v1006_v53  ;;  %v1030_v58 = vadd.f32 %v1677_v10, %v1010_v54 }
 0x284   : > { %1042 = sbr.rel (%p1377_p3) target bundleno = 667 (0x29b), region = 72 }
 0x285   : > { %v894_v60 = vpop.f32.mrf.mxu2  ;;  %v904_v61 = vpop.f32.mrf.mxu3 }
 0x286   : > { %v1014_v62 = vmul.f32 %v981_v32, %v894_v60  ;;  %v1018_v63 = vmul.f32 %v1001_v59, %v904_v61 }
 0x288   : > { %v1034_v0 = vadd.f32 %v1677_v10, %v1014_v62  ;;  %v1038_v1 = vadd.f32 %v1677_v10, %v1018_v63 }
 0x289   : > { %v1043_v2 = vmax.f32 %v2095_v16, 0.0  ;;  %v1044_v3 = vmax.f32 %v2103_v30, 0.0  ;;  %v1045_v4 = vmax.f32 %v1025_v44, 0.0  ;;  %v1046_v5 = vmax.f32 %v1026_v57, 0.0 }
 0x28a   : > { %v1047_v6 = vmax.f32 %v2097_v17, 0.0  ;;  %v1048_v7 = vmax.f32 %v2105_v31, 0.0  ;;  %v1049_v8 = vmax.f32 %v2111_v45, 0.0  ;;  %v1050_v9 = vmax.f32 %v1030_v58, 0.0 }
 0x28b   : > { %1059 = vst [vmem:[#allocation11] sm:$0xff] %v1043_v2  ;;  %v1051_v10 = vmax.f32 %v2099_v28, 0.0  ;;  %v1052_v11 = vmax.f32 %v2107_v42, 0.0  ;;  %v1053_v12 = vmax.f32 %v1033_v55, 0.0  ;;  %v1054_v13 = vmax.f32 %v1034_v0, 0.0 }
 0x28c   : > { %1060 = vst [vmem:[#allocation11 + $0x8] sm:$0xff] %v1044_v3  ;;  %v1055_v14 = vmax.f32 %v2101_v29, 0.0  ;;  %v1056_v15 = vmax.f32 %v2109_v43, 0.0  ;;  %v1057_v18 = vmax.f32 %v1037_v56, 0.0  ;;  %v1058_v19 = vmax.f32 %v1038_v1, 0.0 }
 0x28d   : > { %1061 = vst [vmem:[#allocation11 + $0x10] sm:$0xff] %v1045_v4 }
 0x28e   : > { %1062 = vst [vmem:[#allocation11 + $0x18] sm:$0xff] %v1046_v5 }
 0x28f   : > { %1063 = vst [vmem:[#allocation11 + $0x20] sm:$0xff] %v1047_v6 }
 0x290   : > { %1064 = vst [vmem:[#allocation11 + $0x28] sm:$0xff] %v1048_v7 }
 0x291   : > { %1065 = vst [vmem:[#allocation11 + $0x30] sm:$0xff] %v1049_v8 }
 0x292   : > { %1066 = vst [vmem:[#allocation11 + $0x38] sm:$0xff] %v1050_v9 }
 0x293   : > { %1067 = vst [vmem:[#allocation11 + $0x40] sm:$0xff] %v1051_v10 }
 0x294   : > { %1068 = vst [vmem:[#allocation11 + $0x48] sm:$0xff] %v1052_v11 }
 0x295   : > { %1069 = vst [vmem:[#allocation11 + $0x50] sm:$0xff] %v1053_v12 }
 0x296   : > { %1070 = vst [vmem:[#allocation11 + $0x58] sm:$0xff] %v1054_v13 }
 0x297   : > { %1071 = vst [vmem:[#allocation11 + $0x60] sm:$0xff] %v1055_v14 }
 0x298   : > { %1072 = vst [vmem:[#allocation11 + $0x68] sm:$0xff] %v1056_v15 }
 0x299   : > { %1073 = vst [vmem:[#allocation11 + $0x70] sm:$0xff] %v1057_v18 }
 0x29a   : > { %1074 = vst [vmem:[#allocation11 + $0x78] sm:$0xff] %v1058_v19 }
 0x29b PF: > { %p1378_p12 = scmp.ne.s32.totalorder %s1939_s25, 2 }
 0x29d   : > { %1078 = sbr.rel (%p1378_p12) target bundleno = 690 (0x2b2), region = 76 }
 0x2a2   : > { %1079 = vst [vmem:[#allocation11] sm:$0xff] %v2095_v16 }
 0x2a3   : > { %1080 = vst [vmem:[#allocation11 + $0x8] sm:$0xff] %v2103_v30 }
 0x2a4   : > { %1081 = vst [vmem:[#allocation11 + $0x10] sm:$0xff] %v1025_v44 }
 0x2a5   : > { %1082 = vst [vmem:[#allocation11 + $0x18] sm:$0xff] %v1026_v57 }
 0x2a6   : > { %1083 = vst [vmem:[#allocation11 + $0x20] sm:$0xff] %v2097_v17 }
 0x2a7   : > { %1084 = vst [vmem:[#allocation11 + $0x28] sm:$0xff] %v2105_v31 }
 0x2a8   : > { %1085 = vst [vmem:[#allocation11 + $0x30] sm:$0xff] %v2111_v45 }
 0x2a9   : > { %1086 = vst [vmem:[#allocation11 + $0x38] sm:$0xff] %v1030_v58 }
 0x2aa   : > { %1087 = vst [vmem:[#allocation11 + $0x40] sm:$0xff] %v2099_v28 }
 0x2ab   : > { %1088 = vst [vmem:[#allocation11 + $0x48] sm:$0xff] %v2107_v42 }
 0x2ac   : > { %1089 = vst [vmem:[#allocation11 + $0x50] sm:$0xff] %v1033_v55 }
 0x2ad   : > { %1090 = vst [vmem:[#allocation11 + $0x58] sm:$0xff] %v1034_v0 }
 0x2ae   : > { %1091 = vst [vmem:[#allocation11 + $0x60] sm:$0xff] %v2101_v29 }
 0x2af   : > { %1092 = vst [vmem:[#allocation11 + $0x68] sm:$0xff] %v2109_v43 }
 0x2b0   : > { %1093 = vst [vmem:[#allocation11 + $0x70] sm:$0xff] %v1037_v56 }
 0x2b1   : > { %1094 = vst [vmem:[#allocation11 + $0x78] sm:$0xff] %v1038_v1 }
 0x2b2 PF: > { %p1631_p0 = scmp.eq.s32.totalorder %s1939_s25, 2  ;;  %s1880_s9 = smov [#allocation11]  }
 0x2b3   : > { %s1100_s10 = sshll.u32 %s1880_s9, 4  ;;  %s1102_s13 = sshll.u32 %s2156_s6, 4  ;;  %s1101_s10 = int_to_ptr.vmem [resolvable:$true] %s1100_s10  ;;  %s1103_s13 = int_to_ptr.hbm [resolvable:$true] %s1102_s13 }
 0x2b4   : > { %s1881_s7 = smov 128   ;;  %s1882_s14 = smov 8  }
 0x2b5   : > { %1607 = dma.vmem_to_hbm [thread:$0]  (%p1631_p0), %s1101_s10, 2048, %s1103_s13, [#allocation5], %s1881_s7, %s1881_s7, %s1882_s14  }
 0x2b6   : > { %1855 = dma.done.wait (%p1631_p0), [#allocation5], 2048  }
 0x2b7   : > { %1857 = vsyncadd (%p1631_p0), [#allocation5], 4294965248 }
 0x2b8 PF: > { %p19_p2 = scmp.ge.s32.totalorder %s1973_s26, 5   ;;  %s2161_s21 = smov %s1864_s22 }
 0x2b9   : > { %s2162_s22 = smov %s1868_s23  ;;  %s2163_s23 = smov %s1984_s28 }
 0x2ba   : > { %s2164_s24 = smov %s1973_s26  ;;  %21 = sbr.rel (!%p19_p2) target bundleno = 6 (0x6), region = 113 }
 0x2bf   :  { %1119 = vsyncpa [#allocation4], 1 }
 0x2c0   :  { %1121 = vsyncpa [#allocation4 + $0x1], 1 }
 0x2c1   :  { %1122 = vsyncpa [#allocation7], 1 }
 0x2c2   :  { %1123 = vsyncpa [#allocation10], 1 }
 0x2c3   :  { %1125 = vsyncpa [#allocation10 + $0x1], 1 }
 0x2c4   :  { %1126 = vsyncpa [#allocation5], 1 }
 0x2c5   :  { %1128 = vsyncpa [#allocation5 + $0x1], 1 }

</bundles_post_ra>
